<compile_context>
chip_gen: v7x
topology: tpu7x:2x2x1
jax: 0.10.0
libtpu: 0.0.40
codegen_flags: <defaults>
</compile_context>

<pallas_src>
import math

import jax
import jax.numpy as jnp
from jax.experimental import pallas as pl
from jax.experimental.pallas import tpu as pltpu


def _add_pe_kernel(x_ref, pe_ref, o_ref):
    # x_ref/o_ref block: (TB, TS, LANE); pe_ref block: (1, TS, LANE).
    # fp32 add (matches PyTorch promotion against the fp32 buffer), broadcast
    # over the leading batch-block dim.
    o_ref[...] = (x_ref[...].astype(jnp.float32) + pe_ref[...]).astype(o_ref.dtype)


def _fold_factor(s: int, d: int) -> int:
    """Smallest k with s % k == 0 and (k*d) % 128 == 0 (lane-dense), else 1."""
    if d % 128 == 0:
        return 1
    need = 128 // math.gcd(d, 128)
    if s % need == 0:
        return need
    return 1  # masked-store fallback (see TODO at top of file)


def _choose_tiles(b: int, s_rows: int, lane: int, x_itemsize: int,
                  budget_bytes: int):
    """Pick (tb, ts) so that a (tb, ts, lane) fp32 block is ~budget_bytes.

    ts is either the full (small) row extent or a multiple of the dtype-aware
    sublane quantum; the grid uses pl.cdiv so s_rows need not divide evenly.
    """
    q = max(8, 32 // max(x_itemsize, 1))       # 8 f32, 16 bf16/fp16, 32 int8/fp8
    row_bytes = lane * 4                        # widest stream (fp32 out / pe)
    budget_rows = max(1, budget_bytes // row_bytes)
    if s_rows <= q:
        ts = s_rows                             # block == full (small) seq axis
    else:
        ts = min((budget_rows // q) * q, (s_rows // q) * q)
        ts = max(ts, q)
    tb = max(1, min(b, budget_bytes // max(ts * row_bytes, 1)))
    return tb, ts


def _build_pe_table(s: int, d: int) -> jax.Array:
    """Exactly the PyTorch buffer (fp32): pe[:,0::2]=sin(pos*div), pe[:,1::2]=cos."""
    position = jnp.arange(s, dtype=jnp.float32)[:, None]                       # (s, 1)
    div_term = jnp.exp(
        jnp.arange(0, d, 2, dtype=jnp.float32) * (-math.log(10000.0) / d)
    )                                                                          # (d//2,)
    angles = position * div_term                                               # (s, d//2)
    # interleave sin/cos -> [sin0, cos0, sin1, cos1, ...]
    return jnp.stack([jnp.sin(angles), jnp.cos(angles)], axis=-1).reshape(s, d)


def positional_encoding(x: jax.Array, max_len: int = 5000,
                        block_budget_bytes: int = 4 << 20) -> jax.Array:
    """x: (B, S, D). Returns x + pe[:, :S, :] with PyTorch promotion semantics."""
    b, s, d = x.shape
    assert s <= max_len, "sequence length exceeds max_len"
    assert d % 2 == 0, "d_model must be even (matches PyTorch buffer layout)"

    out_dtype = jnp.promote_types(x.dtype, jnp.float32)
    x_itemsize = jnp.dtype(x.dtype).itemsize
    o_itemsize = jnp.dtype(out_dtype).itemsize

    # Precompute the fp32 table once in the wrapper (mirrors the torch buffer).
    pe = _build_pe_table(s, d)                                                 # (s, d) f32

    # Fold sequence rows into the lane axis so the last dim is 128-dense.
    k = _fold_factor(s, d)
    lane = k * d
    s_rows = s // k
    x2 = x.reshape(b, s_rows, lane)
    pe2 = pe.reshape(1, s_rows, lane)

    tb, ts = _choose_tiles(b, s_rows, lane, x_itemsize, block_budget_bytes)
    # seq tiles outer, batch tiles inner -> the batch-invariant pe tile stays
    # VMEM-resident across the inner batch loop.
    grid = (pl.cdiv(s_rows, ts), pl.cdiv(b, tb))

    cost = pl.CostEstimate(
        flops=b * s * d,
        transcendentals=0,
        bytes_accessed=b * s * d * (x_itemsize + o_itemsize) + s * d * 4,
    )

    out2 = pl.pallas_call(
        _add_pe_kernel,
        out_shape=jax.ShapeDtypeStruct((b, s_rows, lane), out_dtype),
        grid_spec=pltpu.PrefetchScalarGridSpec(
            num_scalar_prefetch=0,
            grid=grid,
            in_specs=[
                pl.BlockSpec((tb, ts, lane), lambda j, bb: (bb, j, 0)),  # x
                pl.BlockSpec((1, ts, lane), lambda j, bb: (0, j, 0)),    # pe (batch-invariant)
            ],
            out_specs=pl.BlockSpec((tb, ts, lane), lambda j, bb: (bb, j, 0)),
        ),
        compiler_params=pltpu.CompilerParams(
            dimension_semantics=("parallel", "parallel"),
            vmem_limit_bytes=32 * 1024 * 1024,  # covers 3 streams x 2 bufs x 4 MiB on all gens
        ),
        cost_estimate=cost,
    )(x2, pe2)

    return out2.reshape(b, s, d)


def _reference(x: jax.Array, max_len: int = 5000) -> jax.Array:
    # Pure-JAX reference mirroring the PyTorch buffer construction + promotion.
    b, s, d = x.shape
    position = jnp.arange(0, max_len, dtype=jnp.float32)[:, None]             # (max_len, 1)
    div_term = jnp.exp(
        jnp.arange(0, d, 2, dtype=jnp.float32) * (-math.log(10000.0) / d)
    )                                                                          # (d/2,)
    pe = jnp.zeros((max_len, d), dtype=jnp.float32)
    pe = pe.at[:, 0::2].set(jnp.sin(position * div_term))
    pe = pe.at[:, 1::2].set(jnp.cos(position * div_term))
    return x.astype(jnp.float32) + pe[None, :s, :]


if __name__ == "__main__":
    key = jax.random.PRNGKey(0)
    B, S, D = 2, 8, 32  # batch, seq, d_model (tiny demo shapes)
    x = jax.random.normal(key, (B, S, D), dtype=jnp.float32)

    out = jax.block_until_ready(positional_encoding(x))
    ref = _reference(x)
    assert out.shape == ref.shape and out.dtype == ref.dtype
    assert jnp.allclose(out, ref, atol=1e-5, rtol=1e-5), "mismatch vs reference"

    # Robustness checks: partial last block via cdiv grid (S=50 -> 25 folded rows,
    # tile 24) and the masked-store fallback (D=96, S=7 not foldable).
    for (B2, S2, D2) in [(3, 50, 64), (2, 7, 96)]:
        k2 = jax.random.fold_in(key, S2 * D2 + B2)
        x2 = jax.random.normal(k2, (B2, S2, D2), dtype=jnp.float32)
        o2 = jax.block_until_ready(positional_encoding(x2))
        r2 = _reference(x2)
        assert o2.shape == r2.shape
        assert jnp.allclose(o2, r2, atol=1e-5, rtol=1e-5), f"mismatch at {(B2, S2, D2)}"

    print("KERNEL_OK")
</pallas_src>

<mosaic_0001>
module attributes {stable_mosaic.version = 11 : i64} {
  func.func @_add_pe_kernel(%arg0: i32, %arg1: i32, %arg2: memref<2x2x128xf32, #tpu.memory_space<vmem>>, %arg3: memref<1x2x128xf32, #tpu.memory_space<vmem>>, %arg4: memref<2x2x128xf32, #tpu.memory_space<vmem>>) attributes {dimension_semantics = [#tpu.dimension_semantics<parallel>, #tpu.dimension_semantics<parallel>], iteration_bounds = array<i64: 1, 1>, scalar_prefetch = 0 : i64, scratch_operands = 0 : i64, tpu.core_type = #tpu.core_type<tc>, window_params = [{transform_indices = @transform_0, window_bounds = array<i64: 2, 2, 128>}, {transform_indices = @transform_1, window_bounds = array<i64: 1, 2, 128>}, {transform_indices = @transform_2, window_bounds = array<i64: 2, 2, 128>}]} {
    %c0 = arith.constant 0 : index
    %c0_0 = arith.constant 0 : index
    %c0_1 = arith.constant 0 : index
    %0 = vector.load %arg2[%c0, %c0_0, %c0_1] : memref<2x2x128xf32, #tpu.memory_space<vmem>>, vector<2x2x128xf32>
    %c0_2 = arith.constant 0 : index
    %c0_3 = arith.constant 0 : index
    %c0_4 = arith.constant 0 : index
    %1 = vector.load %arg3[%c0_2, %c0_3, %c0_4] : memref<1x2x128xf32, #tpu.memory_space<vmem>>, vector<1x2x128xf32>
    %2 = vector.broadcast %1 : vector<1x2x128xf32> to vector<2x2x128xf32>
    %3 = arith.addf %0, %2 : vector<2x2x128xf32>
    %c0_5 = arith.constant 0 : index
    %c0_6 = arith.constant 0 : index
    %c0_7 = arith.constant 0 : index
    %4 = vector.load %arg4[%c0_5, %c0_6, %c0_7] : memref<2x2x128xf32, #tpu.memory_space<vmem>>, vector<2x2x128xf32>
    tpu.vector_store %arg4[%c0_5, %c0_6, %c0_7], %3 {strides = array<i32>} : memref<2x2x128xf32, #tpu.memory_space<vmem>>, vector<2x2x128xf32>,
    return
  }
  func.func @transform_0(%arg0: i32, %arg1: i32) -> (i32, i32, i32) {
    %c0_i32 = arith.constant 0 : i32
    %c0_i32_0 = arith.constant 0 : i32
    return %arg1, %arg0, %c0_i32 : i32, i32, i32
  }
  func.func @transform_1(%arg0: i32, %arg1: i32) -> (i32, i32, i32) {
    %c0_i32 = arith.constant 0 : i32
    %c0_i32_0 = arith.constant 0 : i32
    %c0_i32_1 = arith.constant 0 : i32
    return %c0_i32, %arg0, %c0_i32_0 : i32, i32, i32
  }
  func.func @transform_2(%arg0: i32, %arg1: i32) -> (i32, i32, i32) {
    %c0_i32 = arith.constant 0 : i32
    %c0_i32_0 = arith.constant 0 : i32
    return %arg1, %arg0, %c0_i32 : i32, i32, i32
  }
}

</mosaic_0001>

<bundles_post_ra>
// kernel: tpu_custom_call.1
= control target key start
LH: loop header
LB: loop body
LE: loop exit
PB: predicated region body
PF: predicated region fallthrough
CT: control target
= control target key end

     0   :  { %7 = vsyncpa [#allocation3], 0  ;;  %s154_s0 = inlined_call_operand.hbm [shape: f32[2,2,128], index: 0, kind: input, shape index: {}]   ;;  %s155_s1 = inlined_call_operand.vmem [shape: f32[1,2,128], index: 1, kind: input, shape index: {}]   ;;  %s156_s2 = inlined_call_operand.hbm [shape: f32[2,2,128], index: 2, kind: output, shape index: {}]  }
   0x1   :  { %8 = vsyncpa [#allocation4], 0  ;;  %s102_s9 = smov [#allocation2]   ;;  %s54_s13 = scalar_lea.hbm %s154_s0, 64 }
   0x2   :  { %s14_s10 = sshll.u32 %s102_s9, 4  ;;  %p55_p0 = scmp.ne.s32.totalorder %s154_s0, %s54_s13  ;;  %s15_s10 = int_to_ptr.vmem [resolvable:$true] %s14_s10 }
   0x3   :  { %p58_p1 = scmp.lt.u32.totalorder %s54_s13, %s154_s0 }
   0x5   :  { %p60_p2 = pnand %p58_p1, %p55_p0 }
   0x7   :  { %63 = shalt.err (!%p60_p2)
}
   0x8   :  { %s64_s18 = scalar_lea.vmem %s15_s10, 64  ;;  %p69_p4 = scmp.lt.s32.totalorder %s15_s10, %s15_s10 }
   0x9   :  { %p65_p3 = scmp.ne.s32.totalorder %s15_s10, %s64_s18  ;;  %p70_p5 = scmp.lt.s32.totalorder %s64_s18, %s64_s18 }
   0xb   :  { %p71_p6 = por %p70_p5, %p69_p4 }
   0xd   :  { %p72_p7 = pnand %p71_p6, %p65_p3 }
   0xf   :  { %75 = shalt.err (!%p72_p7)
}
  0x10   :  { %s103_s19 = smov 32   ;;  %s104_s20 = smov 2  }
  0x11   :  { %20 = dma.hbm_to_vmem [thread:$0]  %s154_s0, 64, %s15_s10, [#allocation3], %s103_s19, %s103_s19, %s104_s20  }
  0x12   :  { %98 = dma.done.wait [#allocation3], 64  }
  0x13   :  { %99 = vsyncadd [#allocation3], 4294967232  ;;  %s105_s23 = smov [#allocation5]   ;;  %v26_v0 = vld [vmem:[#allocation2] sm:$0x3] }
  0x14   :  { %s38_s24 = sshll.u32 %s105_s23, 4  ;;  %v28_v1 = vld [vmem:[%s155_s1] sm:$0x3]  ;;  %v27_v2 = vld [vmem:[#allocation2 + $0x2] sm:$0x3]  ;;  %s39_s24 = int_to_ptr.vmem [resolvable:$true] %s38_s24 }
  0x15   :  { %v29_v3 = vadd.f32 %v28_v1, %v26_v0  ;;  %v30_v4 = vadd.f32 %v28_v1, %v27_v2  ;;  %s76_s27 = scalar_lea.vmem %s39_s24, 64  ;;  %p81_p9 = scmp.lt.s32.totalorder %s39_s24, %s39_s24 }
  0x16   :  { %p77_p8 = scmp.ne.s32.totalorder %s39_s24, %s76_s27  ;;  %p82_p10 = scmp.lt.s32.totalorder %s76_s27, %s76_s27 }
  0x17   :  { %31 = vst [vmem:[#allocation5] sm:$0x3] %v29_v3  ;;  %32 = vst [vmem:[#allocation5 + $0x2] sm:$0x3] %v30_v4 }
  0x18   :  { %p83_p11 = por %p82_p10, %p81_p9 }
  0x1a   :  { %p84_p12 = pnand %p83_p11, %p77_p8 }
  0x1c   :  { %87 = shalt.err (!%p84_p12)
}
  0x1d   :  { %s88_s29 = scalar_lea.hbm %s156_s2, 64 }
  0x1e   :  { %p89_p13 = scmp.ne.s32.totalorder %s156_s2, %s88_s29  ;;  %p92_p0 = scmp.lt.u32.totalorder %s88_s29, %s156_s2 }
  0x20   :  { %p94_p1 = pnand %p92_p0, %p89_p13 }
  0x22   :  { %97 = shalt.err (!%p94_p1)
}
  0x23   :  { %44 = dma.vmem_to_hbm [thread:$0]  %s39_s24, 64, %s156_s2, [#allocation4], %s103_s19, %s103_s19, %s104_s20  }
  0x24   :  { %100 = dma.done.wait [#allocation4], 64  }
  0x25   :  { %101 = vsyncadd [#allocation4], 4294967232 }
  0x26   :  { %48 = vsyncpa [#allocation3], 1 }
  0x27   :  { %49 = vsyncpa [#allocation4], 1 }

</bundles_post_ra>
